<compile_context>
chip_gen: v7x
topology: tpu7x:2x2x1
jax: 0.10.0
libtpu: 0.0.40
codegen_flags: <defaults>
</compile_context>

<pallas_src>
import functools

import jax
import jax.numpy as jnp
from jax.experimental import pallas as pl
from jax.experimental.pallas import tpu as pltpu


def critic_kernel(x_ref, w1_ref, b1_ref, w2_ref, b2_ref,
                  w3_ref, b3_ref, wv_ref, bv_ref, out_ref):
    # bf16 operands into the MXU, f32 accumulation; bias/ReLU on the VPU in f32.
    x = x_ref[...].astype(jnp.bfloat16)

    h1 = jnp.dot(x, w1_ref[...], preferred_element_type=jnp.float32) + b1_ref[...]
    h1 = jnp.maximum(h1, 0.0)

    h2 = jnp.dot(h1.astype(jnp.bfloat16), w2_ref[...],
                 preferred_element_type=jnp.float32) + b2_ref[...]
    h2 = jnp.maximum(h2, 0.0)

    h3 = jnp.dot(h2.astype(jnp.bfloat16), w3_ref[...],
                 preferred_element_type=jnp.float32) + b3_ref[...]
    h3 = jnp.maximum(h3, 0.0)

    # Value head (64 -> 1): elementwise multiply + lane reduce (VPU/XLU slots)
    # instead of an MXU matmul with a single output column.
    out_ref[...] = jnp.sum(h3 * wv_ref[...], axis=-1, keepdims=True) + bv_ref[...]


def _round_up(x, m):
    return (x + m - 1) // m * m


@functools.partial(jax.jit, static_argnames=("tile_b",))
def critic_forward(state, params, *, tile_b=256):
    """state: [B, state_size] f32 -> value: [B, 1] f32."""
    w1, b1, w2, b2, w3, b3, wv, bv = params
    B, S = state.shape

    # Batch tile: multiple of 8 (sublane) and no larger than the padded batch.
    # Feature dims stay at full extent (satisfies the (8,128) block constraint
    # since they equal the full array dims).
    tile_b = max(8, min(int(tile_b), _round_up(B, 8)))
    tile_b = _round_up(tile_b, 8)
    b_pad = _round_up(B, tile_b)
    if b_pad != B:
        state = jnp.pad(state, ((0, b_pad - B), (0, 0)))
    grid = (b_pad // tile_b,)

    def batch_spec(feat):
        return pl.BlockSpec((tile_b, feat), lambda i: (i, 0))

    def resident_spec(arr):
        # Constant block index -> weight/bias stays VMEM-resident, one DMA.
        return pl.BlockSpec(arr.shape, lambda i: (0, 0))

    # Advisory cost hint for the XLA scheduler around the custom call.
    flops = 2 * b_pad * (S * 512 + 512 * 256 + 256 * 64 + 64 * 1)
    weight_bytes = sum(int(a.size) * a.dtype.itemsize
                       for a in (w1, b1, w2, b2, w3, b3, wv, bv))
    bytes_accessed = b_pad * S * 4 + weight_bytes + b_pad * 4
    cost = pl.CostEstimate(flops=flops, transcendentals=0,
                           bytes_accessed=bytes_accessed)

    out = pl.pallas_call(
        critic_kernel,
        out_shape=jax.ShapeDtypeStruct((b_pad, 1), jnp.float32),
        grid=grid,
        in_specs=[
            batch_spec(S),
            resident_spec(w1), resident_spec(b1),
            resident_spec(w2), resident_spec(b2),
            resident_spec(w3), resident_spec(b3),
            resident_spec(wv), resident_spec(bv),
        ],
        out_specs=pl.BlockSpec((tile_b, 1), lambda i: (i, 0)),
        compiler_params=pltpu.CompilerParams(
            dimension_semantics=("parallel",)),
        cost_estimate=cost,
    )(state, w1, b1, w2, b2, w3, b3, wv, bv)
    return out[:B]


def init_params(key, state_size):
    """PyTorch-Linear-style init: U(-1/sqrt(fan_in), 1/sqrt(fan_in)).

    Hidden-layer weights are pre-transposed to [in, out] and stored in bf16
    (MXU operands); the value-head weight is a (1, 64) f32 row (VPU reduce);
    biases are f32 [1, out].
    """
    sizes = [(state_size, 512), (512, 256), (256, 64), (64, 1)]
    raw = []
    for (fan_in, fan_out) in sizes:
        key, kw, kb = jax.random.split(key, 3)
        bound = 1.0 / jnp.sqrt(jnp.float32(fan_in))
        w = jax.random.uniform(kw, (fan_in, fan_out), jnp.float32, -bound, bound)
        b = jax.random.uniform(kb, (1, fan_out), jnp.float32, -bound, bound)
        raw += [w, b]
    w1, b1, w2, b2, w3, b3, wv, bv = raw
    return (
        w1.astype(jnp.bfloat16), b1,
        w2.astype(jnp.bfloat16), b2,
        w3.astype(jnp.bfloat16), b3,
        wv.reshape(1, 64), bv,            # value head stays f32 (VPU path)
    )


def reference_forward(state, params):
    """Pure-JAX reference mirroring the kernel's bf16-matmul / f32-VPU math."""
    w1, b1, w2, b2, w3, b3, wv, bv = params
    h = jnp.maximum(jnp.dot(state.astype(jnp.bfloat16), w1,
                            preferred_element_type=jnp.float32) + b1, 0.0)
    h = jnp.maximum(jnp.dot(h.astype(jnp.bfloat16), w2,
                            preferred_element_type=jnp.float32) + b2, 0.0)
    h = jnp.maximum(jnp.dot(h.astype(jnp.bfloat16), w3,
                            preferred_element_type=jnp.float32) + b3, 0.0)
    return jnp.sum(h * wv, axis=-1, keepdims=True) + bv


if __name__ == "__main__":
    key = jax.random.PRNGKey(0)
    k_params, k_state = jax.random.split(key)

    batch = 50          # deliberately not a multiple of the tile -> tests padding
    state_size = 32
    tile_b = 16         # small tile so the demo exercises a multi-step grid

    params = init_params(k_params, state_size)
    state = jax.random.normal(k_state, (batch, state_size), jnp.float32)

    value = critic_forward(state, params, tile_b=tile_b)
    value = jax.block_until_ready(value)

    assert value.shape == (batch, 1), value.shape
    ref = reference_forward(state, params)
    assert jnp.allclose(value, ref, atol=2e-3, rtol=2e-3), (
        "Pallas output mismatch vs reference: max abs err "
        f"{jnp.max(jnp.abs(value - ref))}"
    )

    print("KERNEL_OK")
</pallas_src>

<mosaic_0001>
module attributes {stable_mosaic.version = 11 : i64} {
  func.func @critic_kernel(%arg0: i32, %arg1: memref<16x32xf32, #tpu.memory_space<vmem>>, %arg2: memref<32x512xbf16, #tpu.memory_space<vmem>>, %arg3: memref<1x512xf32, #tpu.memory_space<vmem>>, %arg4: memref<512x256xbf16, #tpu.memory_space<vmem>>, %arg5: memref<1x256xf32, #tpu.memory_space<vmem>>, %arg6: memref<256x64xbf16, #tpu.memory_space<vmem>>, %arg7: memref<1x64xf32, #tpu.memory_space<vmem>>, %arg8: memref<1x64xf32, #tpu.memory_space<vmem>>, %arg9: memref<1x1xf32, #tpu.memory_space<vmem>>, %arg10: memref<16x1xf32, #tpu.memory_space<vmem>>) attributes {dimension_semantics = [#tpu.dimension_semantics<parallel>], iteration_bounds = array<i64: 4>, scalar_prefetch = 0 : i64, scratch_operands = 0 : i64, tpu.core_type = #tpu.core_type<tc>, window_params = [{transform_indices = @transform_0, window_bounds = array<i64: 16, 32>}, {pipeline_mode = #tpu.pipeline_mode<synchronous>, transform_indices = @transform_1, window_bounds = array<i64: 32, 512>}, {pipeline_mode = #tpu.pipeline_mode<synchronous>, transform_indices = @transform_2, window_bounds = array<i64: 1, 512>}, {pipeline_mode = #tpu.pipeline_mode<synchronous>, transform_indices = @transform_3, window_bounds = array<i64: 512, 256>}, {pipeline_mode = #tpu.pipeline_mode<synchronous>, transform_indices = @transform_4, window_bounds = array<i64: 1, 256>}, {pipeline_mode = #tpu.pipeline_mode<synchronous>, transform_indices = @transform_5, window_bounds = array<i64: 256, 64>}, {pipeline_mode = #tpu.pipeline_mode<synchronous>, transform_indices = @transform_6, window_bounds = array<i64: 1, 64>}, {pipeline_mode = #tpu.pipeline_mode<synchronous>, transform_indices = @transform_7, window_bounds = array<i64: 1, 64>}, {pipeline_mode = #tpu.pipeline_mode<synchronous>, transform_indices = @transform_8, window_bounds = array<i64: 1, 1>}, {transform_indices = @transform_9, window_bounds = array<i64: 16, 1>}]} {
    %c0 = arith.constant 0 : index
    %c0_0 = arith.constant 0 : index
    %0 = vector.load %arg1[%c0, %c0_0] : memref<16x32xf32, #tpu.memory_space<vmem>>, vector<16x32xf32>
    %1 = arith.truncf %0 : vector<16x32xf32> to vector<16x32xbf16>
    %c0_1 = arith.constant 0 : index
    %c0_2 = arith.constant 0 : index
    %2 = vector.load %arg2[%c0_1, %c0_2] : memref<32x512xbf16, #tpu.memory_space<vmem>>, vector<32x512xbf16>
    %cst = arith.constant dense<0.000000e+00> : vector<16x512xf32>
    %3 = tpu.matmul %1, %2, %cst {dimension_numbers = #tpu.dot_dimension_numbers<[1], [0], [0], [1], [0, 0, 1, 1], [], []>} : vector<16x32xbf16>, vector<32x512xbf16>, vector<16x512xf32> -> vector<16x512xf32>
    %c0_3 = arith.constant 0 : index
    %c0_4 = arith.constant 0 : index
    %4 = vector.load %arg3[%c0_3, %c0_4] : memref<1x512xf32, #tpu.memory_space<vmem>>, vector<1x512xf32>
    %5 = vector.broadcast %4 : vector<1x512xf32> to vector<16x512xf32>
    %6 = arith.addf %3, %5 : vector<16x512xf32>
    %cst_5 = arith.constant 0.000000e+00 : f32
    %7 = vector.broadcast %cst_5 : f32 to vector<16x512xf32>
    %8 = arith.maximumf %6, %7 : vector<16x512xf32>
    %9 = arith.truncf %8 : vector<16x512xf32> to vector<16x512xbf16>
    %c0_6 = arith.constant 0 : index
    %c0_7 = arith.constant 0 : index
    %10 = vector.load %arg4[%c0_6, %c0_7] : memref<512x256xbf16, #tpu.memory_space<vmem>>, vector<512x256xbf16>
    %cst_8 = arith.constant dense<0.000000e+00> : vector<16x256xf32>
    %11 = tpu.matmul %9, %10, %cst_8 {dimension_numbers = #tpu.dot_dimension_numbers<[1], [0], [0], [1], [0, 0, 1, 1], [], []>} : vector<16x512xbf16>, vector<512x256xbf16>, vector<16x256xf32> -> vector<16x256xf32>
    %c0_9 = arith.constant 0 : index
    %c0_10 = arith.constant 0 : index
    %12 = vector.load %arg5[%c0_9, %c0_10] : memref<1x256xf32, #tpu.memory_space<vmem>>, vector<1x256xf32>
    %13 = vector.broadcast %12 : vector<1x256xf32> to vector<16x256xf32>
    %14 = arith.addf %11, %13 : vector<16x256xf32>
    %cst_11 = arith.constant 0.000000e+00 : f32
    %15 = vector.broadcast %cst_11 : f32 to vector<16x256xf32>
    %16 = arith.maximumf %14, %15 : vector<16x256xf32>
    %17 = arith.truncf %16 : vector<16x256xf32> to vector<16x256xbf16>
    %c0_12 = arith.constant 0 : index
    %c0_13 = arith.constant 0 : index
    %18 = vector.load %arg6[%c0_12, %c0_13] : memref<256x64xbf16, #tpu.memory_space<vmem>>, vector<256x64xbf16>
    %cst_14 = arith.constant dense<0.000000e+00> : vector<16x64xf32>
    %19 = tpu.matmul %17, %18, %cst_14 {dimension_numbers = #tpu.dot_dimension_numbers<[1], [0], [0], [1], [0, 0, 1, 1], [], []>} : vector<16x256xbf16>, vector<256x64xbf16>, vector<16x64xf32> -> vector<16x64xf32>
    %c0_15 = arith.constant 0 : index
    %c0_16 = arith.constant 0 : index
    %20 = vector.load %arg7[%c0_15, %c0_16] : memref<1x64xf32, #tpu.memory_space<vmem>>, vector<1x64xf32>
    %21 = vector.broadcast %20 : vector<1x64xf32> to vector<16x64xf32>
    %22 = arith.addf %19, %21 : vector<16x64xf32>
    %cst_17 = arith.constant 0.000000e+00 : f32
    %23 = vector.broadcast %cst_17 : f32 to vector<16x64xf32>
    %24 = arith.maximumf %22, %23 : vector<16x64xf32>
    %c0_18 = arith.constant 0 : index
    %c0_19 = arith.constant 0 : index
    %25 = vector.load %arg8[%c0_18, %c0_19] : memref<1x64xf32, #tpu.memory_space<vmem>>, vector<1x64xf32>
    %26 = vector.broadcast %25 : vector<1x64xf32> to vector<16x64xf32>
    %27 = arith.mulf %24, %26 : vector<16x64xf32>
    %cst_20 = arith.constant dense<0.000000e+00> : vector<16xf32>
    %28 = vector.multi_reduction <add>, %27, %cst_20 [1] : vector<16x64xf32> to vector<16xf32>
    %29 = vector.shape_cast %28 : vector<16xf32> to vector<16x1xf32>
    %c0_21 = arith.constant 0 : index
    %c0_22 = arith.constant 0 : index
    %30 = vector.load %arg9[%c0_21, %c0_22] : memref<1x1xf32, #tpu.memory_space<vmem>>, vector<1x1xf32>
    %31 = vector.broadcast %30 : vector<1x1xf32> to vector<16x1xf32>
    %32 = arith.addf %29, %31 : vector<16x1xf32>
    %c0_23 = arith.constant 0 : index
    %c0_24 = arith.constant 0 : index
    %33 = vector.load %arg10[%c0_23, %c0_24] : memref<16x1xf32, #tpu.memory_space<vmem>>, vector<16x1xf32>
    tpu.vector_store %arg10[%c0_23, %c0_24], %32 {strides = array<i32>} : memref<16x1xf32, #tpu.memory_space<vmem>>, vector<16x1xf32>,
    return
  }
  func.func @transform_0(%arg0: i32) -> (i32, i32) {
    %c0_i32 = arith.constant 0 : i32
    %c0_i32_0 = arith.constant 0 : i32
    return %arg0, %c0_i32 : i32, i32
  }
  func.func @transform_1(%arg0: i32) -> (i32, i32) {
    %c0_i32 = arith.constant 0 : i32
    %c0_i32_0 = arith.constant 0 : i32
    %c0_i32_1 = arith.constant 0 : i32
    return %c0_i32, %c0_i32_0 : i32, i32
  }
  func.func @transform_2(%arg0: i32) -> (i32, i32) {
    %c0_i32 = arith.constant 0 : i32
    %c0_i32_0 = arith.constant 0 : i32
    %c0_i32_1 = arith.constant 0 : i32
    return %c0_i32, %c0_i32_0 : i32, i32
  }
  func.func @transform_3(%arg0: i32) -> (i32, i32) {
    %c0_i32 = arith.constant 0 : i32
    %c0_i32_0 = arith.constant 0 : i32
    %c0_i32_1 = arith.constant 0 : i32
    return %c0_i32, %c0_i32_0 : i32, i32
  }
  func.func @transform_4(%arg0: i32) -> (i32, i32) {
    %c0_i32 = arith.constant 0 : i32
    %c0_i32_0 = arith.constant 0 : i32
    %c0_i32_1 = arith.constant 0 : i32
    return %c0_i32, %c0_i32_0 : i32, i32
  }
  func.func @transform_5(%arg0: i32) -> (i32, i32) {
    %c0_i32 = arith.constant 0 : i32
    %c0_i32_0 = arith.constant 0 : i32
    %c0_i32_1 = arith.constant 0 : i32
    return %c0_i32, %c0_i32_0 : i32, i32
  }
  func.func @transform_6(%arg0: i32) -> (i32, i32) {
    %c0_i32 = arith.constant 0 : i32
    %c0_i32_0 = arith.constant 0 : i32
    %c0_i32_1 = arith.constant 0 : i32
    return %c0_i32, %c0_i32_0 : i32, i32
  }
  func.func @transform_7(%arg0: i32) -> (i32, i32) {
    %c0_i32 = arith.constant 0 : i32
    %c0_i32_0 = arith.constant 0 : i32
    %c0_i32_1 = arith.constant 0 : i32
    return %c0_i32, %c0_i32_0 : i32, i32
  }
  func.func @transform_8(%arg0: i32) -> (i32, i32) {
    %c0_i32 = arith.constant 0 : i32
    %c0_i32_0 = arith.constant 0 : i32
    %c0_i32_1 = arith.constant 0 : i32
    return %c0_i32, %c0_i32_0 : i32, i32
  }
  func.func @transform_9(%arg0: i32) -> (i32, i32) {
    %c0_i32 = arith.constant 0 : i32
    %c0_i32_0 = arith.constant 0 : i32
    return %arg0, %c0_i32 : i32, i32
  }
}

</mosaic_0001>

<bundles_post_ra>
// kernel: critic_forward.1
= control target key start
LH: loop header
LB: loop body
LE: loop exit
PB: predicated region body
PF: predicated region fallthrough
CT: control target
= control target key end

     0   :  { %s1836_s0 = inlined_call_operand.vmem [shape: f32[64,32], index: 0, kind: input, shape index: {}]   ;;  %s1837_s1 = inlined_call_operand.vmem [shape: bf16[32,512], index: 1, kind: input, shape index: {}]   ;;  %s1838_s2 = inlined_call_operand.vmem [shape: f32[1,512], index: 2, kind: input, shape index: {}]   ;;  %s1839_s3 = inlined_call_operand.hbm [shape: bf16[512,256], index: 3, kind: input, shape index: {}]   ;;  %s1840_s4 = inlined_call_operand.vmem [shape: f32[1,256], index: 4, kind: input, shape index: {}]   ;;  %s1841_s5 = inlined_call_operand.vmem [shape: bf16[256,64], index: 5, kind: input, shape index: {}]   ;;  %s1842_s6 = inlined_call_operand.vmem [shape: f32[1,64], index: 6, kind: input, shape index: {}]   ;;  %s1843_s7 = inlined_call_operand.vmem [shape: f32[1,64], index: 7, kind: input, shape index: {}]   ;;  %s1844_s8 = inlined_call_operand.<no memory space> [shape: f32[1,1], index: 8, kind: input, shape index: {}]   ;;  %s1845_s9 = inlined_call_operand.vmem [shape: f32[64,1], index: 9, kind: output, shape index: {}]  }
   0x1   :  { %v14_v0 = vstv %s1844_s8 }
   0x2   :  { %15 = vst [vmem:[#allocation2] sm:$0x1] %v14_v0 }
   0x3   :  { %16 = vsyncpa [#allocation4], 0  ;;  %s1670_s11 = smov 0  }
   0x4 LB: > { %s1291_s12 = sadd.s32 4294967295, %s1611_s11   ;;  %p1293_p0 = scmp.ge.s32.totalorder %s1611_s11, 1  ;;  %s1611_s11 = sphi %s1670_s11, %s22_s11  }
   0x5   : > { %p247_p1 = scmp.lt.s32.totalorder %s1611_s11, 5  ;;  %s1613_s13 = smov [#allocation3]  }
   0x6   : > { %s265_s14 = sshll.u32 %s1613_s13, 4  ;;  %p1684_p3 = scmp.eq.s32.totalorder %s1291_s12, 0  ;;  %s266_s14 = int_to_ptr.vmem [resolvable:$true] %s265_s14 }
   0x7   : > { %p1678_p2 = pnand %p1293_p0, %p247_p1  ;;  %s1573_s19 = scalar_lea.hbm %s1839_s3, 8192 }
   0x8   : > { %s1850_s15 = scalar_select %p1684_p3, 1, 0 }
   0x9   : > { %s1849_s8 = scalar_select %p1678_p2, 1, 0 }
   0xa   : > { %p1431_p4 = pneg %p1678_p2  ;;  %p1574_p6 = scmp.ne.s32.totalorder %s1839_s3, %s1573_s19 }
   0xb   : > { %p1580_p10 = scmp.lt.u32.totalorder %s1573_s19, %s1839_s3 }
   0xc   : > { %p1692_p5 = pnand %p1684_p3, %p1431_p4 }
   0xe   : > { %p1575_p7 = pneg %p1692_p5 }
  0x10   : > { %p1576_p8 = pnand %p1575_p7, %p1574_p6 }
  0x12   : > { %p1577_p9 = pneg %p1576_p8 }
  0x14   : > { %p1582_p11 = pnand %p1580_p10, %p1577_p9 }
  0x16   : > { %1585 = shalt.err (!%p1582_p11)
}
  0x17   : > { %s1586_s24 = scalar_lea.vmem %s266_s14, 8192  ;;  %p1594_p1 = scmp.lt.s32.totalorder %s266_s14, %s266_s14 }
  0x18   : > { %p1587_p12 = scmp.ne.s32.totalorder %s266_s14, %s1586_s24  ;;  %p1595_p4 = scmp.lt.s32.totalorder %s1586_s24, %s1586_s24 }
  0x1a   : > { %p1589_p13 = pnand %p1587_p12, %p1575_p7  ;;  %p1596_p3 = por %p1595_p4, %p1594_p1 }
  0x1c   : > { %p1590_p0 = pneg %p1589_p13 }
  0x1e   : > { %p1597_p2 = pnand %p1596_p3, %p1590_p0 }
  0x20   : > { %1600 = shalt.err (!%p1597_p2)
}
  0x21   : > { %s1614_s25 = smov 128   ;;  %s1615_s26 = smov 8  }
  0x22   : > { %1434 = dma.hbm_to_vmem [thread:$0]  (!%p1692_p5), %s1839_s3, 8192, %s266_s14, [#allocation4], %s1614_s25, %s1614_s25, %s1615_s26  }
  0x23   : > { %p1852_p6 = scmp.ne.s32.totalorder %s1849_s8, 0 }
  0x24   : > { %p1853_p8 = scmp.ne.s32.totalorder (!%p1852_p6), %s1850_s15, 0 }
  0x25   : > { %305 = sbr.rel (%p1852_p6) target bundleno = 877 (0x36d), region = 56 }
  0x2c   : > { %1606 = dma.done.wait (%p1853_p8), [#allocation4], 8192  }
  0x2d   : > { %1608 = vsyncadd (%p1853_p8), [#allocation4], 4294959104  ;;  %s1298_s29 = sshll.u32 %s1291_s12, 1  ;;  %v1616_v1 = vmov 0   ;;  %v1449_v2 = vld [vmem:[%s1837_s1 + $0x4] ss:$16 sps:$4 sm:$0xff]  }
  0x2e   : > { %463 = vmatprep.mubr.bf16.mxu0 %v1616_v1  ;;  %p342_p2 = scmp.lt.s32.totalorder %s1298_s29, 7  ;;  %v1451_v3 = vld [vmem:[%s1837_s1] ss:$16 sps:$4 sm:$0xff]   ;;  %431 = vmatprep.subr.bf16.mxu0 %v1449_v2  ;;  %v1452_v4 = vld [vmem:[%s1837_s1 + $0x24] ss:$16 sps:$4 sm:$0xff]   ;;  %vm427_vm0 = vcmask 261120  }
  0x2f   : > { %v1454_v5 = vld [vmem:[%s1837_s1 + $0x20] ss:$16 sps:$4 sm:$0xff]   ;;  %432 = vmatpush1.bf16.msra.mxu0 %v1451_v3  ;;  %v1457_v8 = vld [vmem:[%s1837_s1 + $0xc] ss:$16 sps:$4 sm:$0xff]   ;;  %v1455_v9 = vld [vmem:[%s1837_s1 + $0x8] ss:$16 sps:$4 sm:$0xff]  }
  0x30   : > { %s1855_s29 = smov (!%p342_p2, %s1298_s29), 7  ;;  %433 = vmatprep.subr.bf16.mxu0 %v1452_v4  ;;  %v1461_v11 = vld [vmem:[#allocation3 + $0x4] ss:$8 sps:$4 sm:$0xff]   ;;  %v1463_v12 = vld [vmem:[#allocation3] ss:$8 sps:$4 sm:$0xff]   ;;  %vm1204_vm1 = vcmask 523264  }
  0x31   : > { %s1299_s30 = sshll.u32 %s1855_s29, 3  ;;  %v1460_v13 = vld [vmem:[%s1837_s1 + $0x2c] ss:$16 sps:$4 sm:$0xff]   ;;  %925 = vmatprep.subr.bf16.mxu1 %v1461_v11  ;;  %v1458_v17 = vld [vmem:[%s1837_s1 + $0x28] ss:$16 sps:$4 sm:$0xff]   ;;  %vm1220_vm2 = vcmask 7168  }
  0x32   : > { %s345_s14 = scalar_lea.vmem %s1836_s0, %s1299_s30  ;;  %v1464_v14 = vld [vmem:[#allocation3 + $0x14] ss:$8 sps:$4 sm:$0xff]   ;;  %926 = vmatpush1.bf16.msra.mxu1 %v1463_v12  ;;  %v1466_v15 = vld [vmem:[#allocation3 + $0x10] ss:$8 sps:$4 sm:$0xff]   ;;  %v1467_v16 = vld [vmem:[#allocation3 + $0x24] ss:$8 sps:$4 sm:$0xff]   ;;  %s351_s16 = scalar_lea.vmem %s1845_s9, %s1299_s30 }
  0x33   : > { %v354_v6 = vld [vmem:[%s345_s14] sm:$0xff]  ;;  %v355_v7 = vld [vmem:[%s345_s14 + $0x8] sm:$0xff]  ;;  %434 = vmatpush1.bf16.msra.mxu0 %v1454_v5  ;;  %927 = vmatprep.subr.bf16.mxu1 %v1464_v14  ;;  %v1478_v23 = vld [vmem:[#allocation3 + $0x30] ss:$8 sps:$4 sm:$0xff]   ;;  %v367_v14 = vlaneseq }
  0x34   : > { %v356_v10 = vpack.c.bf16 %v355_v7, %v354_v6  ;;  %474 = vmatprep.subr.bf16.mxu0 %v1457_v8  ;;  %v1471_v18 = vld [vmem:[#allocation3 + $0x104] ss:$8 sps:$4 sm:$0xff]   ;;  %v1472_v19 = vld [vmem:[#allocation3 + $0x20] ss:$8 sps:$4 sm:$0xff]   ;;  %v1473_v20 = vld [vmem:[#allocation3 + $0x34] ss:$8 sps:$4 sm:$0xff]  }
  0x35   : > { %v1469_v21 = vld [vmem:[#allocation3 + $0x100] ss:$8 sps:$4 sm:$0xff]   ;;  %v1477_v22 = vld [vmem:[#allocation3 + $0x114] ss:$8 sps:$4 sm:$0xff]   ;;  %v1479_v24 = vld [vmem:[#allocation3 + $0x44] ss:$8 sps:$4 sm:$0xff]  }
  0x36   : > { %1310 = vmatmul.mubr.msk.bf16.vlgmr.msra.gmra.mrb[0].mxu0 %vm427_vm0, %v356_v10  ;;  %928 = vmatpush1.bf16.msra.mxu1 %v1466_v15  ;;  %v1475_v25 = vld [vmem:[#allocation3 + $0x110] ss:$8 sps:$4 sm:$0xff]   ;;  %v1483_v26 = vld [vmem:[#allocation3 + $0x124] ss:$8 sps:$4 sm:$0xff]   ;;  %v1484_v27 = vld [vmem:[#allocation3 + $0x40] ss:$8 sps:$4 sm:$0xff]  }
  0x37   : > { %475 = vmatpush1.bf16.msra.mxu0 %v1455_v9  ;;  %506 = vmatprep.mubr.bf16.mxu0 %v1616_v1  ;;  %v1485_v28 = vld [vmem:[#allocation3 + $0x54] ss:$8 sps:$4 sm:$0xff]   ;;  %v1481_v29 = vld [vmem:[#allocation3 + $0x120] ss:$8 sps:$4 sm:$0xff]   ;;  %v1490_v31 = vld [vmem:[#allocation3 + $0x50] ss:$8 sps:$4 sm:$0xff]  }
  0x38   : > { %476 = vmatprep.subr.bf16.mxu0 %v1460_v13  ;;  %929 = vmatprep.subr.bf16.mxu1 %v1467_v16  ;;  %v1489_v30 = vld [vmem:[#allocation3 + $0x134] ss:$8 sps:$4 sm:$0xff]   ;;  %v1491_v32 = vld [vmem:[#allocation3 + $0x64] ss:$8 sps:$4 sm:$0xff]   ;;  %v1487_v33 = vld [vmem:[#allocation3 + $0x130] ss:$8 sps:$4 sm:$0xff]  }
  0x39   : > { %v1495_v34 = vld [vmem:[#allocation3 + $0x144] ss:$8 sps:$4 sm:$0xff]   ;;  %v1496_v35 = vld [vmem:[#allocation3 + $0x60] ss:$8 sps:$4 sm:$0xff]   ;;  %v1497_v36 = vld [vmem:[#allocation3 + $0x74] ss:$8 sps:$4 sm:$0xff]  }
  0x3a   : > { %930 = vmatpush1.bf16.msra.mxu1 %v1472_v19  ;;  %v1493_v37 = vld [vmem:[#allocation3 + $0x140] ss:$8 sps:$4 sm:$0xff]   ;;  %v1501_v38 = vld [vmem:[#allocation3 + $0x154] ss:$8 sps:$4 sm:$0xff]   ;;  %v1502_v39 = vld [vmem:[#allocation3 + $0x70] ss:$8 sps:$4 sm:$0xff]  }
  0x3b   : > { %477 = vmatpush1.bf16.msra.mxu0 %v1458_v17  ;;  %931 = vmatprep.subr.bf16.mxu1 %v1473_v20  ;;  %v1503_v40 = vld [vmem:[#allocation3 + $0x84] ss:$8 sps:$4 sm:$0xff]   ;;  %v1499_v41 = vld [vmem:[#allocation3 + $0x150] ss:$8 sps:$4 sm:$0xff]   ;;  %v1505_v43 = vld [vmem:[#allocation3 + $0x160] ss:$8 sps:$4 sm:$0xff]  }
  0x3c   : > { %968 = vmatprep.subr.bf16.mxu0 %v1471_v18  ;;  %v1507_v42 = vld [vmem:[#allocation3 + $0x164] ss:$8 sps:$4 sm:$0xff]   ;;  %v1508_v44 = vld [vmem:[#allocation3 + $0x80] ss:$8 sps:$4 sm:$0xff]   ;;  %v1509_v45 = vld [vmem:[#allocation3 + $0x94] ss:$8 sps:$4 sm:$0xff]  }
  0x3d   : > { %v1513_v46 = vld [vmem:[#allocation3 + $0x174] ss:$8 sps:$4 sm:$0xff]   ;;  %v1514_v47 = vld [vmem:[#allocation3 + $0x90] ss:$8 sps:$4 sm:$0xff]   ;;  %v1515_v48 = vld [vmem:[#allocation3 + $0xa4] ss:$8 sps:$4 sm:$0xff]  }
  0x3e   : > { %1311 = vmatmul.mubr.msk.bf16.vlgmr.msra.gmra.mrb[4].mxu0 %vm427_vm0, %v356_v10  ;;  %932 = vmatpush1.bf16.msra.mxu1 %v1478_v23  ;;  %v1511_v49 = vld [vmem:[#allocation3 + $0x170] ss:$8 sps:$4 sm:$0xff]   ;;  %v1519_v50 = vld [vmem:[#allocation3 + $0x184] ss:$8 sps:$4 sm:$0xff]   ;;  %v1520_v51 = vld [vmem:[#allocation3 + $0xa0] ss:$8 sps:$4 sm:$0xff]  }
  0x3f   : > { %969 = vmatpush1.bf16.msra.mxu0 %v1469_v21  ;;  %933 = vmatprep.subr.bf16.mxu1 %v1479_v24  ;;  %v1521_v52 = vld [vmem:[#allocation3 + $0xb4] ss:$8 sps:$4 sm:$0xff]   ;;  %v1517_v53 = vld [vmem:[#allocation3 + $0x180] ss:$8 sps:$4 sm:$0xff]   ;;  %v1526_v55 = vld [vmem:[#allocation3 + $0xb0] ss:$8 sps:$4 sm:$0xff]  }
  0x40   : > { %970 = vmatprep.subr.bf16.mxu0 %v1477_v22  ;;  %v1525_v54 = vld [vmem:[#allocation3 + $0x194] ss:$8 sps:$4 sm:$0xff]   ;;  %v1527_v56 = vld [vmem:[#allocation3 + $0xc4] ss:$8 sps:$4 sm:$0xff]   ;;  %v1523_v57 = vld [vmem:[#allocation3 + $0x190] ss:$8 sps:$4 sm:$0xff]  }
  0x41   : > { %v1531_v58 = vld [vmem:[#allocation3 + $0x1a4] ss:$8 sps:$4 sm:$0xff]   ;;  %v1532_v59 = vld [vmem:[#allocation3 + $0xc0] ss:$8 sps:$4 sm:$0xff]   ;;  %v1533_v60 = vld [vmem:[#allocation3 + $0xd4] ss:$8 sps:$4 sm:$0xff]  }
  0x42   : > { %934 = vmatpush1.bf16.msra.mxu1 %v1484_v27  ;;  %v1529_v61 = vld [vmem:[#allocation3 + $0x1a0] ss:$8 sps:$4 sm:$0xff]   ;;  %v1537_v62 = vld [vmem:[#allocation3 + $0x1b4] ss:$8 sps:$4 sm:$0xff]   ;;  %v1535_v63 = vld [vmem:[#allocation3 + $0x1b0] ss:$8 sps:$4 sm:$0xff]  }
  0x43   : > { %971 = vmatpush1.bf16.msra.mxu0 %v1475_v25  ;;  %935 = vmatprep.subr.bf16.mxu1 %v1485_v28  ;;  %v1538_v0 = vld [vmem:[#allocation3 + $0xd0] ss:$8 sps:$4 sm:$0xff]   ;;  %v1539_v1 = vld [vmem:[#allocation3 + $0xe4] ss:$8 sps:$4 sm:$0xff]   ;;  %v1541_v3 = vld [vmem:[#allocation3 + $0x1c0] ss:$8 sps:$4 sm:$0xff]  }
  0x44   : > { %972 = vmatprep.subr.bf16.mxu0 %v1483_v26  ;;  %v1543_v2 = vld [vmem:[#allocation3 + $0x1c4] ss:$8 sps:$4 sm:$0xff]   ;;  %v1544_v4 = vld [vmem:[#allocation3 + $0xe0] ss:$8 sps:$4 sm:$0xff]   ;;  %v1545_v5 = vld [vmem:[#allocation3 + $0xf4] ss:$8 sps:$4 sm:$0xff]  }
  0x45   : > { %v1549_v6 = vld [vmem:[#allocation3 + $0x1d4] ss:$8 sps:$4 sm:$0xff]   ;;  %v1547_v7 = vld [vmem:[#allocation3 + $0x1d0] ss:$8 sps:$4 sm:$0xff]   ;;  %v1553_v9 = vld [vmem:[#allocation3 + $0x1e4] ss:$8 sps:$4 sm:$0xff]  }
  0x46   : > { %936 = vmatpush1.bf16.msra.mxu1 %v1490_v31  ;;  %v1550_v8 = vld [vmem:[#allocation3 + $0xf0] ss:$8 sps:$4 sm:$0xff]   ;;  %v1551_v10 = vld [vmem:[#allocation3 + $0x1e0] ss:$8 sps:$4 sm:$0xff]   ;;  %v1556_v11 = vld [vmem:[#allocation3 + $0x1f4] ss:$8 sps:$4 sm:$0xff]  }
  0x47   : > { %973 = vmatpush1.bf16.msra.mxu0 %v1481_v29  ;;  %937 = vmatprep.subr.bf16.mxu1 %v1491_v32  ;;  %v1554_v12 = vld [vmem:[#allocation3 + $0x1f0] ss:$8 sps:$4 sm:$0xff]   ;;  %v1557_v13 = vld [vmem:[%s1841_s5 + $0x40] sm:$0xff]   ;;  %v1757_v15 = vshrl.u32 %v367_v14, 7 }
  0x48   : > { %974 = vmatprep.subr.bf16.mxu0 %v1489_v30  ;;  %v365_v17 = vld [vmem:[%s1838_s2] sm:$0xf] }
  0x49   : > { %v369_v16 = vsub.s32 0, %v1757_v15  ;;  %v373_v18 = vsub.s32 1, %v1757_v15  ;;  %v377_v24 = vsub.s32 2, %v1757_v15  ;;  %v381_v27 = vsub.s32 3, %v1757_v15 }
  0x4a   : > { %938 = vmatpush1.bf16.msra.mxu1 %v1496_v35 }
  0x4b   : > { %975 = vmatpush1.bf16.msra.mxu0 %v1487_v33  ;;  %939 = vmatprep.subr.bf16.mxu1 %v1497_v36  ;;  %v370_v19 = vrot.slane %v365_v17, %v369_v16  ;;  %v374_v20 = vrot.slane %v365_v17, %v373_v18  ;;  %v378_v33 = vrot.slane %v365_v17, %v377_v24 }
  0x4c   : > { %976 = vmatprep.subr.bf16.mxu0 %v1495_v34  ;;  %v382_v36 = vrot.slane %v365_v17, %v381_v27 }
  0x4e   : > { %940 = vmatpush1.bf16.msra.mxu1 %v1502_v39 }
  0x4f   : > { %977 = vmatpush1.bf16.msra.mxu0 %v1493_v37  ;;  %941 = vmatprep.subr.bf16.mxu1 %v1503_v40  ;;  %v1558_v40 = vld [vmem:[%s1841_s5] sm:$0xff]  }
  0x50   : > { %978 = vmatprep.subr.bf16.mxu0 %v1501_v38 }
  0x52   : > { %942 = vmatpush1.bf16.msra.mxu1 %v1508_v44 }
  0x53   : > { %979 = vmatpush1.bf16.msra.mxu0 %v1499_v41  ;;  %943 = vmatprep.subr.bf16.mxu1 %v1509_v45 }
  0x54   : > { %980 = vmatprep.subr.bf16.mxu0 %v1507_v42 }
  0x56   : > { %944 = vmatpush1.bf16.msra.mxu1 %v1514_v47 }
  0x57   : > { %981 = vmatpush1.bf16.msra.mxu0 %v1505_v43  ;;  %945 = vmatprep.subr.bf16.mxu1 %v1515_v48  ;;  %v1559_v43 = vld [vmem:[%s1841_s5 + $0x48] sm:$0xff]  }
  0x58   : > { %982 = vmatprep.subr.bf16.mxu0 %v1513_v46 }
  0x5a   : > { %946 = vmatpush1.bf16.msra.mxu1 %v1520_v51 }
  0x5b   : > { %983 = vmatpush1.bf16.msra.mxu0 %v1511_v49  ;;  %947 = vmatprep.subr.bf16.mxu1 %v1521_v52  ;;  %v1560_v49 = vld [vmem:[%s1841_s5 + $0x8] sm:$0xff]   ;;  %v1561_v52 = vld [vmem:[%s1841_s5 + $0x50] sm:$0xff]  }
  0x5c   : > { %984 = vmatprep.subr.bf16.mxu0 %v1519_v50 }
  0x5e   : > { %948 = vmatpush1.bf16.msra.mxu1 %v1526_v55 }
  0x5f   : > { %985 = vmatpush1.bf16.msra.mxu0 %v1517_v53  ;;  %949 = vmatprep.subr.bf16.mxu1 %v1527_v56 }
  0x60   : > { %986 = vmatprep.subr.bf16.mxu0 %v1525_v54 }
  0x62   : > { %950 = vmatpush1.bf16.msra.mxu1 %v1532_v59  ;;  %v1564_v59 = vld [vmem:[%s1841_s5 + $0x18] sm:$0xff]  }
  0x63   : > { %987 = vmatpush1.bf16.msra.mxu0 %v1523_v57  ;;  %951 = vmatprep.subr.bf16.mxu1 %v1533_v60  ;;  %v1562_v57 = vld [vmem:[%s1841_s5 + $0x10] sm:$0xff]   ;;  %v1565_v60 = vld [vmem:[%s1841_s5 + $0x60] sm:$0xff]  }
  0x64   : > { %988 = vmatprep.subr.bf16.mxu0 %v1531_v58  ;;  %v1563_v58 = vld [vmem:[%s1841_s5 + $0x58] sm:$0xff]  }
  0x66   : > { %952 = vmatpush1.bf16.msra.mxu1 %v1538_v0  ;;  %v1569_v0 = vld [vmem:[%s1841_s5 + $0x70] sm:$0xff]  }
  0x67   : > { %989 = vmatpush1.bf16.msra.mxu0 %v1529_v61  ;;  %953 = vmatprep.subr.bf16.mxu1 %v1539_v1  ;;  %v1566_v61 = vld [vmem:[%s1841_s5 + $0x20] sm:$0xff]   ;;  %v1570_v1 = vld [vmem:[%s1841_s5 + $0x30] sm:$0xff]  }
  0x68   : > { %990 = vmatprep.subr.bf16.mxu0 %v1537_v62  ;;  %v1567_v62 = vld [vmem:[%s1841_s5 + $0x68] sm:$0xff]  }
  0x6a   : > { %954 = vmatpush1.bf16.msra.mxu1 %v1544_v4  ;;  %v593_v4 = vld [vmem:[%s1840_s4] sm:$0x3] }
  0x6b   : > { %991 = vmatpush1.bf16.msra.mxu0 %v1535_v63  ;;  %955 = vmatprep.subr.bf16.mxu1 %v1545_v5  ;;  %v1568_v63 = vld [vmem:[%s1841_s5 + $0x28] sm:$0xff]  }
  0x6c   : > { %992 = vmatprep.subr.bf16.mxu0 %v1543_v2  ;;  %v1571_v2 = vld [vmem:[%s1841_s5 + $0x78] sm:$0xff]  }
  0x6e   : > { %956 = vmatpush1.bf16.msra.mxu1 %v1550_v8  ;;  %v598_v8 = vrot.slane %v593_v4, %v369_v16 }
  0x6f   : > { %993 = vmatpush1.bf16.msra.mxu0 %v1541_v3  ;;  %1397 = vmatprep.subr.bf16.mxu1 %v1557_v13  ;;  %v1572_v3 = vld [vmem:[%s1841_s5 + $0x38] sm:$0xff]  }
  0x70   : > { %994 = vmatprep.subr.bf16.mxu0 %v1549_v6 }
  0x73   : > { %995 = vmatpush1.bf16.msra.mxu0 %v1547_v7 }
  0x74   : > { %996 = vmatprep.subr.bf16.mxu0 %v1553_v9 }
  0x77   : > { %997 = vmatpush1.bf16.msra.mxu0 %v1551_v10  ;;  %v602_v10 = vrot.slane %v593_v4, %v373_v18  ;;  %v1376_v18 = vld [vmem:[%s1842_s6] ss:$0 sm:$0xff] }
  0x78   : > { %998 = vmatprep.subr.bf16.mxu0 %v1556_v11 }
  0x7b   : > { %999 = vmatpush1.bf16.msra.mxu0 %v1554_v12 }
 0x109   : > { %v465_v21 = vpop.f32.mrb[0].mxu0 }
 0x10a   : > { %v466_v22 = vadd.f32 %v465_v21, %v370_v19  ;;  %v467_v23 = vpop.f32.mrb[1].mxu0 }
 0x10b   : > { %v468_v25 = vadd.f32 %v467_v23, %v374_v20  ;;  %v469_v26 = vpop.f32.mrb[2].mxu0 }
 0x10c   : > { %v470_v28 = vadd.f32 %v469_v26, %v370_v19  ;;  %v471_v29 = vpop.f32.mrb[3].mxu0  ;;  %v517_v31 = vmax.f32 %v466_v22, 0.0 }
 0x10d   : > { %v472_v30 = vadd.f32 %v471_v29, %v374_v20  ;;  %v518_v34 = vmax.f32 %v468_v25, 0.0 }
 0x10e   : > { %v521_v32 = vmax.f32 %v470_v28, 0.0 }
 0x10f   : > { %v522_v35 = vmax.f32 %v472_v30, 0.0 }
 0x110   : > { %v525_v37 = vpack.c.bf16 %v521_v32, %v517_v31 }
 0x111   : > { %v508_v38 = vpop.f32.mrb[4].mxu0  ;;  %v526_v39 = vpack.c.bf16 %v522_v35, %v518_v34 }
 0x112   : > { %v509_v41 = vadd.f32 %v508_v38, %v378_v33  ;;  %v510_v42 = vpop.f32.mrb[5].mxu0 }
 0x113   : > { %v511_v44 = vadd.f32 %v510_v42, %v382_v36  ;;  %v512_v45 = vpop.f32.mrb[6].mxu0  ;;  %957 = vmatprep.mubr.bf16.mxu1 %v526_v39 }
 0x114   : > { %v513_v46 = vadd.f32 %v512_v45, %v378_v33  ;;  %v514_v47 = vpop.f32.mrb[7].mxu0  ;;  %958 = vmatmul.mubr.bf16.vlgmr.msra.gmra.mrb[0].mxu1 %v525_v37  ;;  %v519_v50 = vmax.f32 %v509_v41, 0.0  ;;  %v1393_v37 = vld [vmem:[%s1843_s7] ss:$0 sm:$0xff] }
 0x115   : > { %v515_v48 = vadd.f32 %v514_v47, %v382_v36  ;;  %1398 = vmatpush3.bf16.msra.mxu1 %v1558_v40  ;;  %v520_v53 = vmax.f32 %v511_v44, 0.0  ;;  %v1394_v45 = vld [vmem:[#allocation2] ss:$0 sm:$0xff] }
 0x116   : > { %v523_v51 = vmax.f32 %v513_v46, 0.0  ;;  %1399 = vmatprep.subr.bf16.mxu1 %v1559_v43 }
 0x117   : > { %v524_v54 = vmax.f32 %v515_v48, 0.0 }
 0x118   : > { %v527_v55 = vpack.c.bf16 %v523_v51, %v519_v50 }
 0x119   : > { %v528_v56 = vpack.c.bf16 %v524_v54, %v520_v53  ;;  %1400 = vmatpush3.bf16.msra.mxu1 %v1560_v49 }
 0x11a   : > { %1401 = vmatprep.subr.bf16.mxu1 %v1561_v52 }
 0x11b   : > { %1000 = vmatprep.mubr.bf16.mxu0 %v528_v56 }
 0x11c   : > { %1001 = vmatmul.mubr.bf16.vlgmr.msra.gmra.mrb[8].mxu0 %v527_v55 }
 0x11d   : > { %1402 = vmatpush3.bf16.msra.mxu1 %v1562_v57 }
 0x11e   : > { %1403 = vmatprep.subr.bf16.mxu1 %v1563_v58 }
 0x121   : > { %1404 = vmatpush3.bf16.msra.mxu1 %v1564_v59 }
 0x122   : > { %1405 = vmatprep.subr.bf16.mxu1 %v1565_v60 }
 0x125   : > { %1406 = vmatpush3.bf16.msra.mxu1 %v1566_v61 }
 0x126   : > { %1407 = vmatprep.subr.bf16.mxu1 %v1567_v62 }
 0x129   : > { %1408 = vmatpush3.bf16.msra.mxu1 %v1568_v63 }
 0x12a   : > { %1409 = vmatprep.subr.bf16.mxu1 %v1569_v0 }
 0x12d   : > { %1410 = vmatpush3.bf16.msra.mxu1 %v1570_v1 }
 0x12e   : > { %1411 = vmatprep.subr.bf16.mxu1 %v1571_v2 }
 0x131   : > { %1412 = vmatpush3.bf16.msra.mxu1 %v1572_v3 }
 0x1e7   : > { %v959_v5 = vpop.f32.mrb[0].mxu1 }
 0x1e8   : > { %v961_v6 = vpop.f32.mrb[1].mxu1  ;;  %v960_v11 = vadd.f32 %v959_v5, %v598_v8 }
 0x1e9   : > { %v963_v7 = vpop.f32.mrb[2].mxu1  ;;  %v962_v12 = vadd.f32 %v961_v6, %v602_v10 }
 0x1ea   : > { %v965_v9 = vpop.f32.mrb[3].mxu1  ;;  %v964_v14 = vadd.f32 %v963_v7, %v598_v8 }
 0x1eb   : > { %v966_v20 = vadd.f32 %v965_v9, %v602_v10 }
 0x1ef   : > { %v1002_v13 = vpop.f32.mrb[8].mxu0 }
 0x1f0   : > { %v1003_v17 = vadd.f32 %v1002_v13, %v960_v11  ;;  %v1004_v19 = vpop.f32.mrb[9].mxu0 }
 0x1f1   : > { %v1005_v21 = vadd.f32 %v1004_v19, %v962_v12  ;;  %v1006_v22 = vpop.f32.mrb[10].mxu0 }
 0x1f2   : > { %v1007_v23 = vadd.f32 %v1006_v22, %v964_v14  ;;  %v1008_v24 = vpop.f32.mrb[11].mxu0  ;;  %v1011_v26 = vmax.f32 %v1003_v17, 0.0 }
 0x1f3   : > { %v1009_v25 = vadd.f32 %v1008_v24, %v966_v20  ;;  %v1012_v28 = vmax.f32 %v1005_v21, 0.0 }
 0x1f4   : > { %v1013_v27 = vmax.f32 %v1007_v23, 0.0 }
 0x1f5   : > { %v1014_v16 = vmax.f32 %v1009_v25, 0.0 }
 0x1f6   : > { %v1015_v29 = vpack.c.bf16 %v1013_v27, %v1011_v26 }
 0x1f7   : > { %v1016_v30 = vpack.c.bf16 %v1014_v16, %v1012_v28 }
 0x1f9   : > { %1184 = vmatprep.mubr.bf16.mxu1 %v1016_v30 }
 0x1fa   : > { %1185 = vmatmul.mubr.bf16.vlgmr.msra.gmra.mrb[4].mxu1 %v1015_v29 }
 0x2cd   : > { %v1413_v15 = vpop.f32.mrb[4].mxu1 }
 0x2ce   : > { %v1414_v31 = vpop.f32.mrb[5].mxu1 }
 0x2cf   : > { %v1415_v32 = vadd.f32 %v1414_v31, %v1413_v15  ;;  %v1416_v33 = vpop.f32.mrb[6].mxu1 }
 0x2d0   : > { %v1417_v34 = vpop.f32.mrb[7].mxu1 }
 0x2d1   : > { %v1187_v35 = vadd.f32 %v1415_v32, %v1376_v18  ;;  %v1418_v36 = vadd.f32 %v1417_v34, %v1416_v33 }
 0x2d3   : > { %v1193_v38 = vmax.f32 %v1187_v35, 0.0  ;;  %v1190_v39 = vadd.f32 %v1418_v36, %v1376_v18 }
 0x2d5   : > { %v1194_v40 = vmax.f32 %v1190_v39, 0.0  ;;  %v1202_v41 = vmul.f32 %v1393_v37, %v1193_v38 }
 0x2d7   : > { %v1205_v42 = vsel %vm1204_vm1, %v1202_v41, 0.0  ;;  %v1203_v43 = vmul.f32 %v1393_v37, %v1194_v40 }
 0x2d8   : > { %1206 = vadd.xlane.f32.xlu0 %v1205_v42 }
 0x2d9   : > { %v1208_v44 = vsel %vm1204_vm1, %v1203_v43, 0.0 }
 0x2dc   : > { %1209 = vadd.xlane.f32.xlu0 %v1208_v44 }
 0x365   : > { %v1207_v46 = vpop.xlane.xlu0 %1206 }
 0x366   : > { %v1218_v47 = vadd.f32 %v1394_v45, %v1207_v46 }
 0x368   : > { %1221 = vst.msk [vmem:[%s351_s16] sm:$0xff] %vm1220_vm2, %v1218_v47 }
 0x369   : > { %v1210_v48 = vpop.xlane.xlu0 %1209 }
 0x36a   : > { %v1219_v49 = vadd.f32 %v1394_v45, %v1210_v48 }
 0x36c   : > { %1222 = vst.msk [vmem:[%s351_s16 + $0x8] sm:$0xff] %vm1220_vm2, %v1219_v49 }
 0x36d PF: > { %s22_s11 = sadd.s32 1, %s1611_s11  }
 0x36e   : > { %p19_p3 = scmp.ge.s32.totalorder %s22_s11, 6  }
 0x370   :  { %21 = sbr.rel (!%p19_p3) target bundleno = 4 (0x4), region = 91 }
 0x377   :  { %1245 = vsyncpa [#allocation4], 1 }
 0x378   :  { %1247 = vsyncpa [#allocation4 + $0x1], 1 }

</bundles_post_ra>
